<compile_context>
chip_gen: v7x
topology: tpu7x:2x2x1
jax: 0.10.0
libtpu: 0.0.40
codegen_flags: <defaults>
</compile_context>

<pallas_src>
import functools

import jax
import jax.numpy as jnp
from jax.experimental import pallas as pl
from jax.experimental.pallas import tpu as pltpu


def _int_pow(x, g):
    """x ** g for small non-negative integer g via multiply chain (no EUP pow)."""
    result = None
    base = x
    while g > 0:
        if g & 1:
            result = base if result is None else result * base
        g >>= 1
        if g:
            base = base * base
    if result is None:                       # g == 0
        result = jnp.ones_like(x)
    return result


def _focal_loss_kernel(pred_ref, tgt_ref, out_ref, acc_ref, *, gamma, alpha,
                       ignore_index, scale, hw):
    j = pl.program_id(1)
    nj = pl.num_programs(1)

    @pl.when(j == 0)
    def _():
        acc_ref[...] = jnp.zeros_like(acc_ref)

    x = pred_ref[0].astype(jnp.float32)       # (C, T) logits, lane-dense
    tgt = tgt_ref[0]                          # (1, T) int32 labels
    C, T = x.shape

    # validity: in-bounds spatial position AND label != ignore_index
    lane = jax.lax.broadcasted_iota(jnp.int32, (1, T), 1)
    in_bounds = (j * T + lane) < hw
    valid = jnp.logical_and(in_bounds, tgt != ignore_index)    # (1, T)
    vmask = valid.astype(jnp.float32)

    # keep padded / ignored logits finite (their loss is masked to 0 below)
    x = jnp.where(valid, x, 0.0)

    # one-hot target == F.one_hot(target, C+1)[:, :C] for labels < C
    tgt_idx = jnp.where(valid, tgt, 0)
    cls = jax.lax.broadcasted_iota(jnp.int32, (C, T), 0)
    t = (cls == tgt_idx).astype(jnp.float32)                   # (C, T)

    # shared transcendentals: e = exp(-|x|) feeds sigmoid, 1-sigmoid and BCE
    e = jnp.exp(-jnp.abs(x))
    recip = pl.reciprocal(1.0 + e, approx=True)
    pos = x >= 0.0
    p = jnp.where(pos, 1.0, e) * recip        # sigmoid(x)
    q = jnp.where(pos, e, 1.0) * recip        # sigmoid(-x) == 1 - sigmoid(x)

    one_minus_pt = q * t + p * (1.0 - t)
    if float(gamma) == float(int(gamma)) and gamma >= 0.0:
        mod = _int_pow(one_minus_pt, int(gamma))
    else:
        mod = jnp.power(one_minus_pt, gamma)
    focal_w = (alpha * t + (1.0 - alpha) * (1.0 - t)) * mod

    # numerically stable BCE-with-logits, reduction='none'
    bce = jnp.maximum(x, 0.0) - x * t + jnp.log1p(e)

    acc_ref[...] += bce * focal_w * vmask

    @pl.when(j == nj - 1)
    def _():
        total = jnp.sum(acc_ref[...]) * scale          # scaled partial for this n
        out_ref[...] = jnp.broadcast_to(total, out_ref.shape)


def focal_loss(pred, target, *, gamma=2.0, alpha=0.5, loss_weight=1.0,
               ignore_index=255, t_hw=4096):
    """pred: (N, C, H, W) float logits; target: (N, H, W) int class indices.

    Returns the scalar mean sigmoid focal loss (reduction='mean',
    avg_factor=None, weight=None), matching the PyTorch FocalLoss forward
    with use_sigmoid=True.
    """
    N, C, H, W = pred.shape
    HW = H * W

    pred3d = pred.reshape(N, C, HW)                    # free view of NCHW
    tgt3d = target.reshape(N, 1, HW).astype(jnp.int32)

    # lane tile: multiple of 128 (or == HW); cap ~2 MiB pred tile so the
    # double-buffered pipeline fits scoped VMEM on every generation (v7x 64MiB)
    max_t = max(128, ((2 * 1024 * 1024) // (4 * max(C, 1))) // 128 * 128)
    t = min(int(t_hw), max_t)
    if t >= HW:
        t = HW
    else:
        t = max(128, (t // 128) * 128)

    scale = float(loss_weight) / float(N * HW * C)     # mean over all elements

    kernel = functools.partial(
        _focal_loss_kernel, gamma=float(gamma), alpha=float(alpha),
        ignore_index=int(ignore_index), scale=scale, hw=HW)

    out = pl.pallas_call(
        kernel,
        out_shape=jax.ShapeDtypeStruct((N, 8, 128), jnp.float32),
        grid_spec=pltpu.PrefetchScalarGridSpec(
            num_scalar_prefetch=0,
            grid=(N, pl.cdiv(HW, t)),
            in_specs=[
                pl.BlockSpec((1, C, t), lambda n, j: (n, 0, j)),
                pl.BlockSpec((1, 1, t), lambda n, j: (n, 0, j)),
            ],
            out_specs=pl.BlockSpec((1, 8, 128), lambda n, j: (n, 0, 0)),
            scratch_shapes=[pltpu.VMEM((C, t), jnp.float32)],
        ),
        compiler_params=pltpu.CompilerParams(
            dimension_semantics=("parallel", "arbitrary")),
    )(pred3d, tgt3d)

    # each batch row carries its already-scaled partial (broadcast over the
    # 8x128 tile); summing lane 0 across rows gives the mean loss.
    return jnp.sum(out[:, 0, 0])


def _focal_loss_ref(pred, target, *, gamma=2.0, alpha=0.5, loss_weight=1.0,
                    ignore_index=255):
    """Pure-JAX reference mirroring py_sigmoid_focal_loss + mean reduction."""
    N, C, H, W = pred.shape
    x = jnp.transpose(pred, (0, 2, 3, 1)).reshape(-1, C).astype(jnp.float32)
    tgt = target.reshape(-1).astype(jnp.int32)
    valid = (tgt != ignore_index)[:, None].astype(jnp.float32)
    tgt = jnp.where(tgt == ignore_index, 0, tgt)
    t = jax.nn.one_hot(tgt, C, dtype=jnp.float32)
    p = jax.nn.sigmoid(x)
    one_minus_pt = (1.0 - p) * t + p * (1.0 - t)
    fw = (alpha * t + (1.0 - alpha) * (1.0 - t)) * one_minus_pt ** gamma
    bce = jnp.maximum(x, 0.0) - x * t + jnp.log1p(jnp.exp(-jnp.abs(x)))
    loss = bce * fw * valid
    return loss_weight * jnp.mean(loss)


if __name__ == "__main__":
    key = jax.random.PRNGKey(0)
    k1, k2, k3 = jax.random.split(key, 3)

    N, C, H, W = 2, 4, 16, 16
    pred = jax.random.normal(k1, (N, C, H, W), dtype=jnp.float32)
    target = jax.random.randint(k2, (N, H, W), 0, C, dtype=jnp.int32)
    # sprinkle some ignore_index pixels
    ignore_mask = jax.random.uniform(k3, (N, H, W)) < 0.1
    target = jnp.where(ignore_mask, 255, target)

    loss = focal_loss(pred, target, gamma=2.0, alpha=0.5, loss_weight=1.0,
                      ignore_index=255)
    loss = jax.block_until_ready(loss)

    ref = _focal_loss_ref(pred, target, gamma=2.0, alpha=0.5, loss_weight=1.0,
                          ignore_index=255)
    # approx EUP reciprocal inside the kernel -> allow a small relative slack
    assert jnp.allclose(loss, ref, rtol=5e-3, atol=1e-5), (loss, ref)

    print("KERNEL_OK")
</pallas_src>

<mosaic_0001>
module attributes {stable_mosaic.version = 11 : i64} {
  func.func @_focal_loss_kernel(%arg0: i32, %arg1: i32, %arg2: memref<1x4x256xf32, #tpu.memory_space<vmem>>, %arg3: memref<1x1x256xi32, #tpu.memory_space<vmem>>, %arg4: memref<1x8x128xf32, #tpu.memory_space<vmem>>, %arg5: memref<4x256xf32, #tpu.memory_space<vmem>>) attributes {dimension_semantics = [#tpu.dimension_semantics<parallel>, #tpu.dimension_semantics<arbitrary>], iteration_bounds = array<i64: 2, 1>, scalar_prefetch = 0 : i64, scratch_operands = 1 : i64, tpu.core_type = #tpu.core_type<tc>, window_params = [{transform_indices = @transform_0, window_bounds = array<i64: 1, 4, 256>}, {transform_indices = @transform_1, window_bounds = array<i64: 1, 1, 256>}, {transform_indices = @transform_2, window_bounds = array<i64: 1, 8, 128>}]} {
    %c0_i32 = arith.constant 0 : i32
    %0 = arith.cmpi eq, %arg1, %c0_i32 : i32
    %1 = arith.extui %0 : i1 to i32
    %c0_i32_0 = arith.constant 0 : i32
    %2 = arith.cmpi ne, %1, %c0_i32_0 : i32
    scf.if %2 {
      %cst_24 = arith.constant 0.000000e+00 : f32
      %73 = vector.broadcast %cst_24 : f32 to vector<4x256xf32>
      %c0_25 = arith.constant 0 : index
      %c0_26 = arith.constant 0 : index
      %74 = vector.load %arg5[%c0_25, %c0_26] : memref<4x256xf32, #tpu.memory_space<vmem>>, vector<4x256xf32>
      tpu.vector_store %arg5[%c0_25, %c0_26], %73 {strides = array<i32>} : memref<4x256xf32, #tpu.memory_space<vmem>>, vector<4x256xf32>,
    } else {
    }
    %c0 = arith.constant 0 : index
    %c0_1 = arith.constant 0 : index
    %c0_2 = arith.constant 0 : index
    %3 = vector.load %arg2[%c0, %c0_1, %c0_2] : memref<1x4x256xf32, #tpu.memory_space<vmem>>, vector<1x4x256xf32>
    %4 = vector.shape_cast %3 : vector<1x4x256xf32> to vector<4x256xf32>
    %c0_3 = arith.constant 0 : index
    %c0_4 = arith.constant 0 : index
    %c0_5 = arith.constant 0 : index
    %5 = vector.load %arg3[%c0_3, %c0_4, %c0_5] : memref<1x1x256xi32, #tpu.memory_space<vmem>>, vector<1x1x256xi32>
    %6 = vector.shape_cast %5 : vector<1x1x256xi32> to vector<1x256xi32>
    %7 = tpu.iota {dimensions = array<i32: 1>} : vector<1x256xi32>
    %c256_i32 = arith.constant 256 : i32
    %8 = arith.muli %arg1, %c256_i32 : i32
    %9 = vector.broadcast %8 : i32 to vector<1x256xi32>
    %10 = arith.addi %9, %7 : vector<1x256xi32>
    %c256_i32_6 = arith.constant 256 : i32
    %11 = vector.broadcast %c256_i32_6 : i32 to vector<1x256xi32>
    %12 = arith.cmpi slt, %10, %11 : vector<1x256xi32>
    %c255_i32 = arith.constant 255 : i32
    %13 = vector.broadcast %c255_i32 : i32 to vector<1x256xi32>
    %14 = arith.cmpi ne, %6, %13 : vector<1x256xi32>
    %15 = arith.andi %12, %14 : vector<1x256xi1>
    %16 = arith.extui %15 : vector<1x256xi1> to vector<1x256xi32>
    %17 = arith.sitofp %16 : vector<1x256xi32> to vector<1x256xf32>
    %cst = arith.constant 0.000000e+00 : f32
    %18 = vector.shape_cast %15 : vector<1x256xi1> to vector<1x256xi1>
    %19 = vector.broadcast %18 : vector<1x256xi1> to vector<4x256xi1>
    %20 = vector.broadcast %cst : f32 to vector<4x256xf32>
    %21 = arith.select %19, %4, %20 : vector<4x256xi1>, vector<4x256xf32>
    %c0_i32_7 = arith.constant 0 : i32
    %22 = vector.broadcast %c0_i32_7 : i32 to vector<1x256xi32>
    %23 = arith.select %15, %6, %22 : vector<1x256xi1>, vector<1x256xi32>
    %24 = tpu.iota {dimensions = array<i32: 0>} : vector<4x256xi32>
    %25 = vector.broadcast %23 : vector<1x256xi32> to vector<4x256xi32>
    %26 = arith.cmpi eq, %24, %25 : vector<4x256xi32>
    %27 = arith.extui %26 : vector<4x256xi1> to vector<4x256xi32>
    %28 = arith.sitofp %27 : vector<4x256xi32> to vector<4x256xf32>
    %29 = math.absf %21 : vector<4x256xf32>
    %cst_8 = arith.constant 0.000000e+00 : f32
    %30 = vector.broadcast %cst_8 : f32 to vector<4x256xf32>
    %31 = arith.subf %30, %29 : vector<4x256xf32>
    %32 = math.exp %31 : vector<4x256xf32>
    %cst_9 = arith.constant 1.000000e+00 : f32
    %33 = vector.broadcast %cst_9 : f32 to vector<4x256xf32>
    %34 = arith.addf %33, %32 : vector<4x256xf32>
    %35 = tpu.reciprocal %34 {approx = true} : vector<4x256xf32> -> vector<4x256xf32>
    %cst_10 = arith.constant 0.000000e+00 : f32
    %36 = vector.broadcast %cst_10 : f32 to vector<4x256xf32>
    %37 = arith.cmpf oge, %21, %36 : vector<4x256xf32>
    %cst_11 = arith.constant 1.000000e+00 : f32
    %38 = vector.broadcast %cst_11 : f32 to vector<4x256xf32>
    %39 = arith.select %37, %38, %32 : vector<4x256xi1>, vector<4x256xf32>
    %40 = arith.mulf %39, %35 : vector<4x256xf32>
    %cst_12 = arith.constant 1.000000e+00 : f32
    %41 = vector.broadcast %cst_12 : f32 to vector<4x256xf32>
    %42 = arith.select %37, %32, %41 : vector<4x256xi1>, vector<4x256xf32>
    %43 = arith.mulf %42, %35 : vector<4x256xf32>
    %44 = arith.mulf %43, %28 : vector<4x256xf32>
    %cst_13 = arith.constant 1.000000e+00 : f32
    %45 = vector.broadcast %cst_13 : f32 to vector<4x256xf32>
    %46 = arith.subf %45, %28 : vector<4x256xf32>
    %47 = arith.mulf %40, %46 : vector<4x256xf32>
    %48 = arith.addf %44, %47 : vector<4x256xf32>
    %49 = arith.mulf %48, %48 : vector<4x256xf32>
    %cst_14 = arith.constant 5.000000e-01 : f32
    %50 = vector.broadcast %cst_14 : f32 to vector<4x256xf32>
    %51 = arith.mulf %50, %28 : vector<4x256xf32>
    %cst_15 = arith.constant 1.000000e+00 : f32
    %52 = vector.broadcast %cst_15 : f32 to vector<4x256xf32>
    %53 = arith.subf %52, %28 : vector<4x256xf32>
    %cst_16 = arith.constant 5.000000e-01 : f32
    %54 = vector.broadcast %cst_16 : f32 to vector<4x256xf32>
    %55 = arith.mulf %54, %53 : vector<4x256xf32>
    %56 = arith.addf %51, %55 : vector<4x256xf32>
    %57 = arith.mulf %56, %49 : vector<4x256xf32>
    %cst_17 = arith.constant 0.000000e+00 : f32
    %58 = vector.broadcast %cst_17 : f32 to vector<4x256xf32>
    %59 = arith.maximumf %21, %58 : vector<4x256xf32>
    %60 = arith.mulf %21, %28 : vector<4x256xf32>
    %61 = arith.subf %59, %60 : vector<4x256xf32>
    %62 = math.log1p %32 : vector<4x256xf32>
    %63 = arith.addf %61, %62 : vector<4x256xf32>
    %c0_18 = arith.constant 0 : index
    %c0_19 = arith.constant 0 : index
    %64 = vector.load %arg5[%c0_18, %c0_19] : memref<4x256xf32, #tpu.memory_space<vmem>>, vector<4x256xf32>
    %65 = arith.mulf %63, %57 : vector<4x256xf32>
    %66 = vector.broadcast %17 : vector<1x256xf32> to vector<4x256xf32>
    %67 = arith.mulf %65, %66 : vector<4x256xf32>
    %68 = arith.addf %64, %67 : vector<4x256xf32>
    %c0_20 = arith.constant 0 : index
    %c0_21 = arith.constant 0 : index
    %69 = vector.load %arg5[%c0_20, %c0_21] : memref<4x256xf32, #tpu.memory_space<vmem>>, vector<4x256xf32>
    tpu.vector_store %arg5[%c0_20, %c0_21], %68 {strides = array<i32>} : memref<4x256xf32, #tpu.memory_space<vmem>>, vector<4x256xf32>,
    %c0_i32_22 = arith.constant 0 : i32
    %70 = arith.cmpi eq, %arg1, %c0_i32_22 : i32
    %71 = arith.extui %70 : i1 to i32
    %c0_i32_23 = arith.constant 0 : i32
    %72 = arith.cmpi ne, %71, %c0_i32_23 : i32
    scf.if %72 {
      %c0_24 = arith.constant 0 : index
      %c0_25 = arith.constant 0 : index
      %73 = vector.load %arg5[%c0_24, %c0_25] : memref<4x256xf32, #tpu.memory_space<vmem>>, vector<4x256xf32>
      %74 = vector.shape_cast %73 : vector<4x256xf32> to vector<1x4x256xf32>
      %cst_26 = arith.constant dense<0.000000e+00> : vector<1xf32>
      %75 = vector.multi_reduction <add>, %74, %cst_26 [1, 2] : vector<1x4x256xf32> to vector<1xf32>
      %76 = vector.shape_cast %75 : vector<1xf32> to vector<1x1x1xf32>
      %77 = vector.extract %76[0, 0, 0] : f32 from vector<1x1x1xf32>
      %cst_27 = arith.constant 4.8828125E-4 : f32
      %78 = arith.mulf %77, %cst_27 : f32
      %79 = vector.broadcast %78 : f32 to vector<1x8x128xf32>
      %c0_28 = arith.constant 0 : index
      %c0_29 = arith.constant 0 : index
      %c0_30 = arith.constant 0 : index
      %80 = vector.load %arg4[%c0_28, %c0_29, %c0_30] : memref<1x8x128xf32, #tpu.memory_space<vmem>>, vector<1x8x128xf32>
      tpu.vector_store %arg4[%c0_28, %c0_29, %c0_30], %79 {strides = array<i32>} : memref<1x8x128xf32, #tpu.memory_space<vmem>>, vector<1x8x128xf32>,
    } else {
    }
    return
  }
  func.func @transform_0(%arg0: i32, %arg1: i32) -> (i32, i32, i32) {
    %c0_i32 = arith.constant 0 : i32
    %c0_i32_0 = arith.constant 0 : i32
    return %arg0, %c0_i32, %arg1 : i32, i32, i32
  }
  func.func @transform_1(%arg0: i32, %arg1: i32) -> (i32, i32, i32) {
    %c0_i32 = arith.constant 0 : i32
    %c0_i32_0 = arith.constant 0 : i32
    return %arg0, %c0_i32, %arg1 : i32, i32, i32
  }
  func.func @transform_2(%arg0: i32, %arg1: i32) -> (i32, i32, i32) {
    %c0_i32 = arith.constant 0 : i32
    %c0_i32_0 = arith.constant 0 : i32
    %c0_i32_1 = arith.constant 0 : i32
    return %arg0, %c0_i32, %c0_i32_0 : i32, i32, i32
  }
}

</mosaic_0001>

<bundles_post_ra>
// kernel: tpu_custom_call.1
= control target key start
LH: loop header
LB: loop body
LE: loop exit
PB: predicated region body
PF: predicated region fallthrough
CT: control target
= control target key end

     0   :  { %7 = vsyncpa [#allocation4], 0  ;;  %s1067_s0 = inlined_call_operand.hbm [shape: f32[2,4,256], index: 0, kind: input, shape index: {}]   ;;  %s1068_s1 = inlined_call_operand.hbm [shape: s32[2,1,256], index: 1, kind: input, shape index: {}]   ;;  %s1069_s2 = inlined_call_operand.hbm [shape: f32[2,8,128], index: 2, kind: output, shape index: {}]  }
   0x1   :  { %9 = vsyncpa [#allocation4 + $0x1], 0 }
   0x2   :  { %10 = vsyncpa [#allocation7], 0 }
   0x3   :  { %12 = vsyncpa [#allocation7 + $0x1], 0 }
   0x4   :  { %13 = vsyncpa [#allocation5], 0 }
   0x5   :  { %15 = vsyncpa [#allocation5 + $0x1], 0  ;;  %s801_s9 = smov 0   ;;  %s803_s10 = smov 0  }
   0x6   :  { %s805_s11 = smov 0   ;;  %s807_s12 = smov 0  }
   0x7   :  { %s809_s13 = smov 0   ;;  %s811_s14 = smov 0  }
   0x8 LB: > { %s524_s15 = sadd.s32 4294967295, %s779_s14   ;;  %s525_s16 = sadd.s32 4294967294, %s779_s14   ;;  %s779_s14 = sphi %s811_s14, %s21_s14   ;;  %s775_s13 = sphi %s809_s13, %s1095_s13   ;;  %s771_s12 = sphi %s807_s12, %s1094_s12   ;;  %s767_s11 = sphi %s805_s11, %s1093_s11   ;;  %s763_s10 = sphi %s803_s10, %s1092_s10   ;;  %s759_s9 = sphi %s801_s9, %s1091_s9  }
   0x9   : > { %s33_s17 = sadd.s32 1, %s775_s13  ;;  %s42_s18 = sadd.s32 1, %s767_s11 }
   0xa   : > { %p35_p0 = scmp.ge.s32.totalorder %s33_s17, 2  ;;  %p49_p1 = scmp.ne.s32.totalorder %s767_s11, %s763_s10 }
   0xb   : > { %p50_p2 = scmp.eq.s32.totalorder %s779_s14, 0  ;;  %p55_p3 = scmp.ne.s32.totalorder %s763_s10, %s759_s9 }
   0xc   : > { %s1097_s17 = smov (%p35_p0, %s33_s17), 0  ;;  %p56_p5 = scmp.eq.s32.totalorder %s524_s15, 0 }
   0xd   : > { %p842_p4 = por %p50_p2, %p49_p1  ;;  %s37_s20 = ssub.s32 %s775_s13, %s1097_s17 }
   0xe   : > { %p107_p6 = scmp.eq.s32.totalorder %s524_s15, 1  ;;  %p40_p7 = scmp.eq.s32.totalorder %s37_s20, 0 }
   0xf   : > { %p848_p8 = por %p56_p5, %p55_p3  ;;  %p113_p10 = scmp.eq.s32.totalorder %s525_s16, 1 }
  0x10   : > { %p852_p9 = por %p107_p6, %p49_p1  ;;  %p568_p13 = scmp.lt.s32.totalorder %s779_s14, 2 }
  0x11   : > { %s1073_s21 = scalar_select %p848_p8, 1, 0 }
  0x12   : > { %s1074_s22 = scalar_select %p852_p9, 1, 0 }
  0x13   : > { %s857_s23 = scalar_select %p40_p7, %s767_s11, %s42_s18  }
  0x14   : > { %p859_p11 = por %p113_p10, %p55_p3  ;;  %s866_s25 = sand.u32 1, %s767_s11  }
  0x15   : > { %s528_s26 = sshll.u32 %s866_s25, 3  ;;  %s546_s27 = sshll.u32 %s775_s13, 7 }
  0x16   : > { %s1075_s24 = scalar_select %p859_p11, 1, 0 }
  0x17   : > { %s873_s30 = scalar_lea.hbm %s1067_s0, %s546_s27  ;;  %s137_s3 = scalar_lea.vmem [#allocation3], %s528_s26 }
  0x18   : > { %s147_s4 = sshll.u32 %s137_s3, 4  ;;  %p879_p0 = pnand %p568_p13, %p842_p4  ;;  %s875_s4 = int_to_ptr.vmem [resolvable:$true] %s147_s4 }
  0x19   : > { %s134_s6 = scalar_lea.sflag [#allocation4], %s866_s25  ;;  %s633_s7 = scalar_lea.hbm %s873_s30, 128 }
  0x1a   : > { %p634_p3 = scmp.ne.s32.totalorder %s873_s30, %s633_s7  ;;  %p635_p5 = pneg %p879_p0 }
  0x1b   : > { %s638_s16 = scalar_lea.hbm %s1067_s0, 256  ;;  %p639_p4 = scmp.lt.u32.totalorder %s873_s30, %s1067_s0 }
  0x1c   : > { %p636_p6 = pnand %p635_p5, %p634_p3  ;;  %p640_p10 = scmp.lt.u32.totalorder %s638_s16, %s633_s7 }
  0x1d   : > { %p642_p12 = scmp.lt.u32.totalorder %s633_s7, %s873_s30 }
  0x1e   : > { %p637_p7 = pneg %p636_p6  ;;  %p641_p13 = por %p640_p10, %p639_p4 }
  0x20   : > { %p643_p1 = por %p642_p12, %p641_p13 }
  0x22   : > { %p644_p2 = pnand %p643_p1, %p637_p7 }
  0x24   : > { %647 = shalt.err (!%p644_p2)
}
  0x25   : > { %s648_s20 = scalar_lea.vmem %s875_s4, 128  ;;  %s781_s26 = smov [#allocation3]  }
  0x26   : > { %p649_p3 = scmp.ne.s32.totalorder %s875_s4, %s648_s20  ;;  %s653_s27 = sshll.u32 %s781_s26, 4  ;;  %s654_s27 = int_to_ptr.vmem [resolvable:$false] %s653_s27 }
  0x27   : > { %s655_s28 = scalar_lea.vmem %s654_s27, 256  ;;  %p656_p9 = scmp.lt.s32.totalorder %s875_s4, %s654_s27 }
  0x28   : > { %p651_p6 = pnand %p649_p3, %p635_p5  ;;  %p657_p4 = scmp.lt.s32.totalorder %s655_s28, %s648_s20 }
  0x2a   : > { %p652_p11 = pneg %p651_p6  ;;  %p658_p10 = por %p657_p4, %p656_p9 }
  0x2c   : > { %p659_p12 = pnand %p658_p10, %p652_p11 }
  0x2e   : > { %662 = shalt.err (!%p659_p12)
}
  0x2f   : > { %560 = dma.hbm_to_vmem [thread:$0]  (!%p879_p0), %s873_s30, 128, %s875_s4, %s134_s6  }
  0x30   : > { %p1077_p1 = scmp.lt.s32.totalorder %s779_s14, 3  ;;  %p1078_p2 = scmp.ge.s32.totalorder %s779_s14, 1 }
  0x31   : > { %s531_s3 = sshll.u32 %s866_s25, 1  ;;  %s547_s7 = sshll.u32 %s775_s13, 5 }
  0x32   : > { %p915_p7 = pnand %p1078_p2, %p1077_p1  ;;  %s924_s16 = scalar_lea.hbm %s1068_s1, %s547_s7 }
  0x33   : > { %s158_s18 = scalar_lea.vmem [#allocation6], %s531_s3  ;;  %s155_s30 = scalar_lea.sflag [#allocation7], %s866_s25 }
  0x34   : > { %s1079_s29 = scalar_select %p915_p7, 1, 0 }
  0x35   : > { %s168_s19 = sshll.u32 %s158_s18, 4  ;;  %s663_s4 = scalar_lea.hbm %s924_s16, 32  ;;  %s169_s19 = int_to_ptr.vmem [resolvable:$true] %s168_s19 }
  0x36   : > { %p664_p9 = scmp.ne.s32.totalorder %s924_s16, %s663_s4  ;;  %s668_s26 = scalar_lea.hbm %s1068_s1, 64 }
  0x37   : > { %p669_p3 = scmp.lt.u32.totalorder %s924_s16, %s1068_s1  ;;  %p670_p6 = scmp.lt.u32.totalorder %s668_s26, %s663_s4 }
  0x38   : > { %p666_p11 = pnand %p664_p9, %p635_p5  ;;  %p672_p10 = scmp.lt.u32.totalorder %s663_s4, %s924_s16 }
  0x39   : > { %p671_p4 = por %p670_p6, %p669_p3 }
  0x3a   : > { %p667_p13 = pneg %p666_p11 }
  0x3b   : > { %p673_p12 = por %p672_p10, %p671_p4 }
  0x3d   : > { %p674_p1 = pnand %p673_p12, %p667_p13 }
  0x3f   : > { %677 = shalt.err (!%p674_p1)
}
  0x40   : > { %s678_s25 = scalar_lea.vmem %s169_s19, 32  ;;  %s782_s3 = smov [#allocation6]  }
  0x41   : > { %p679_p2 = scmp.ne.s32.totalorder %s169_s19, %s678_s25  ;;  %s683_s7 = sshll.u32 %s782_s3, 4  ;;  %s684_s7 = int_to_ptr.vmem [resolvable:$false] %s683_s7 }
  0x42   : > { %s685_s8 = scalar_lea.vmem %s684_s7, 64  ;;  %p686_p8 = scmp.lt.s32.totalorder %s169_s19, %s684_s7 }
  0x43   : > { %p681_p9 = pnand %p679_p2, %p635_p5  ;;  %p687_p7 = scmp.lt.s32.totalorder %s685_s8, %s678_s25 }
  0x45   : > { %p682_p11 = pneg %p681_p9  ;;  %p688_p3 = por %p687_p7, %p686_p8 }
  0x47   : > { %p689_p6 = pnand %p688_p3, %p682_p11 }
  0x49   : > { %692 = shalt.err (!%p689_p6)
}
  0x4a   : > { %563 = dma.hbm_to_vmem [thread:$0]  (!%p879_p0), %s924_s16, 32, %s169_s19, %s155_s30  }
  0x4b   : > { %p1080_p13 = scmp.ne.s32.totalorder %s1079_s29, 0 }
  0x4c   : > { %s949_s15 = sand.u32 (!%p1080_p13), 1, %s763_s10   ;;  %p1081_p8 = scmp.ne.s32.totalorder (!%p1080_p13), %s1073_s21, 0 }
  0x4d   : > { %177 = sbr.rel (%p1080_p13) target bundleno = 373 (0x175), region = 28  ;;  %s535_s18 = sshll.u32 (!%p1080_p13), %s949_s15, 3 }
  0x4e   : > { %s180_s4 = scalar_lea.sflag (!%p1080_p13), [#allocation4], %s949_s15  ;;  %s183_s6 = scalar_lea.vmem (!%p1080_p13), [#allocation3], %s535_s18 }
  0x54   : > { %746 = dma.done.wait (%p1081_p8), %s180_s4, 128  }
  0x55   : > { %748 = vsyncadd (%p1081_p8), %s180_s4, 4294967168  ;;  %s536_s5 = sshll.u32 %s949_s15, 1  ;;  %s189_s29 = scalar_lea.sflag [#allocation7], %s949_s15 }
  0x56   : > { %s192_s16 = scalar_lea.vmem [#allocation6], %s536_s5 }
  0x57   : > { %750 = dma.done.wait (%p1081_p8), %s189_s29, 32  }
  0x58   : > { %752 = vsyncadd (%p1081_p8), %s189_s29, 4294967264  ;;  %v238_v0 = vlaneseq  ;;  %v226_v4 = vld [vmem:[%s192_s16] sm:$0x3]  ;;  %v783_v5 = vmov 0   ;;  %v225_v7 = vld [vmem:[%s183_s6] sm:$0xff]  ;;  %v784_v34 = vmov 0.0  }
  0x59   : > { %vm236_vm0 = vcmp.ne.s32.totalorder %v226_v4, 255  ;;  %v265_v13 = vcombine.high %v225_v7, %v225_v7  ;;  %vm387_vm11 = vcmask 1043456   ;;  %s217_s21 = scalar_lea.vmem [#allocation8], %s535_s18  ;;  %s543_s30 = sshll.u32 %s771_s12, 7 }
  0x5a   : > { %v239_v1 = vshrl.u32 %v238_v0, 7  ;;  %v237_v6 = vsel %vm236_vm0, 1, %v783_v5  ;;  %s417_s19 = sshll.u32 %s217_s21, 4  ;;  %s1018_s25 = scalar_lea.hbm %s1069_s2, %s543_s30  ;;  %s1020_s19 = int_to_ptr.vmem [resolvable:$true] %s417_s19 }
  0x5b   : > { %s404_s3 = scalar_lea.sflag [#allocation5], %s949_s15  ;;  %s693_s7 = scalar_lea.vmem %s1020_s19, 128 }
  0x5c   : > { %v965_v2 = vsub.s32 0, %v239_v1  ;;  %v244_v3 = vsub.s32 1, %v239_v1  ;;  %p694_p0 = scmp.ne.s32.totalorder %s1020_s19, %s693_s7  ;;  %p1088_p5 = scmp.ne.s32.totalorder %s1074_s22, 0 }
  0x5d   : > { %s785_s12 = smov [#allocation8]  }
  0x5e   : > { %v241_v8 = vrot.slane %v237_v6, %v965_v2  ;;  %v968_v9 = vrot.slane %v237_v6, %v244_v3  ;;  %v272_v24 = vrot.slane %v226_v4, %v965_v2  ;;  %v276_v25 = vrot.slane %v226_v4, %v244_v3  ;;  %p695_p7 = pnand %p694_p0, %p1088_p5  ;;  %s697_s8 = sshll.u32 %s785_s12, 4  ;;  %s698_s8 = int_to_ptr.vmem [resolvable:$false] %s697_s8 }
  0x5f   : > { %s699_s18 = scalar_lea.vmem %s698_s8, 256  ;;  %p700_p10 = scmp.lt.s32.totalorder %s1020_s19, %s698_s8 }
  0x60   : > { %vm970_vm1 = vcmp.ne.s32.totalorder %v241_v8, 0  ;;  %vm247_vm2 = vcmp.ne.s32.totalorder %v968_v9, 0  ;;  %p696_p4 = pneg %p695_p7  ;;  %p701_p12 = scmp.lt.s32.totalorder %s699_s18, %s693_s7 }
  0x61   : > { %v250_v11 = vsel %vm970_vm1, 1, %v783_v5  ;;  %v251_v12 = vsel %vm247_vm2, 1, %v783_v5  ;;  %v277_v26 = vsel %vm970_vm1, %v272_v24, 0  ;;  %v278_v27 = vsel %vm247_vm2, %v276_v25, 0 }
  0x62   : > { %v257_v14 = vrot.slane %v250_v11, %v965_v2  ;;  %v261_v15 = vrot.slane %v251_v12, %v965_v2  ;;  %v284_v28 = vrot.slane %v277_v26, %v965_v2  ;;  %v288_v29 = vrot.slane %v278_v27, %v965_v2  ;;  %p702_p1 = por %p701_p12, %p700_p10 }
  0x64   : > { %vm262_vm3 = vcmp.eq.s32.totalorder %v257_v14, 1  ;;  %vm263_vm4 = vcmp.eq.s32.totalorder %v261_v15, 1  ;;  %vm289_vm5 = vcmp.eq.s32.totalorder %v239_v1, %v284_v28  ;;  %vm290_vm6 = vcmp.eq.s32.totalorder %v239_v1, %v288_v29  ;;  %p703_p2 = pnand %p702_p1, %p696_p4 }
  0x65   : > { %v267_v16 = vsel %vm262_vm3, %v225_v7, 0.0  ;;  %v981_v17 = vsel %vm263_vm4, %v265_v13, 0.0  ;;  %v540_v35 = vsel %vm289_vm5, 1.0, %v784_v34  ;;  %v541_v36 = vsel %vm290_vm6, 1.0, %v784_v34 }
  0x66   : > { %v295_v18 = vand.u32 2147483647, %v267_v16  ;;  %v296_v19 = vand.u32 2147483647, %v981_v17  ;;  %vm307_vm7 = vcmp.ge.f32.partialorder %v267_v16, 0.0  ;;  %vm308_vm8 = vcmp.ge.f32.partialorder %v981_v17, 0.0 }
  0x67   : > { %v319_v39 = vsub.f32 1.0, %v540_v35  ;;  %v320_v40 = vsub.f32 1.0, %v541_v36  ;;  %v327_v41 = vmul.f32 0.5, %v540_v35  ;;  %v335_v42 = vmax.f32 %v267_v16, 0.0 }
  0x68   : > { %v297_v20 = vsub.f32 0.0, %v295_v18  ;;  %v298_v21 = vsub.f32 0.0, %v296_v19  ;;  %v337_v43 = vmul.f32 %v540_v35, %v267_v16  ;;  %v328_v51 = vmul.f32 0.5, %v541_v36 }
  0x69   : > { %v329_v54 = vmul.f32 0.5, %v319_v39  ;;  %v330_v55 = vmul.f32 0.5, %v320_v40  ;;  %v336_v56 = vmax.f32 %v981_v17, 0.0  ;;  %v338_v57 = vmul.f32 %v541_v36, %v981_v17 }
  0x6a   : > { %v299_v22 = vmul.f32 1.442695, %v297_v20  ;;  %v301_v23 = vmul.f32 1.442695, %v298_v21  ;;  %v339_v61 = vsub.f32 %v335_v42, %v337_v43  ;;  %v538_v19 = vsel %vm970_vm1, 1.0, %v784_v34 }
  0x6b   : > { %v340_v14 = vsub.f32 %v336_v56, %v338_v57  ;;  %v331_v17 = vadd.f32 %v329_v54, %v327_v41  ;;  %v332_v21 = vadd.f32 %v330_v55, %v328_v51  ;;  %v367_v29 = vrot.slane %v538_v19, %v965_v2 }
  0x6c   : > { %621 = vpow2.f32 %v299_v22 }
  0x6d   : > { %623 = vpow2.f32 %v301_v23  ;;  %v539_v23 = vsel %vm247_vm2, 1.0, %v784_v34 }
  0x76   : > { %v622_v30 = vpop.eup %621 }
  0x77   : > { %v624_v31 = vpop.eup %623  ;;  %v303_v32 = vadd.f32 1.0, %v622_v30  ;;  %v344_v37 = vmul.f32 -0.5, %v622_v30  ;;  %v309_v45 = vsel %vm307_vm7, 1.0, %v622_v30  ;;  %v313_v46 = vsel %vm307_vm7, %v622_v30, 1.0 }
  0x78   : > { %v304_v33 = vadd.f32 1.0, %v624_v31  ;;  %v353_v38 = vmul.f32 -0.5, %v624_v31  ;;  %v347_v47 = vand.u32 2147483647, %v622_v30  ;;  %v310_v49 = vsel %vm308_vm8, 1.0, %v624_v31 }
  0x79   : > { %625 = vrcp.f32 %v303_v32  ;;  %v345_v44 = vadd.f32 1.0, %v344_v37  ;;  %v314_v50 = vsel %vm308_vm8, %v624_v31, 1.0  ;;  %v356_v52 = vand.u32 2147483647, %v624_v31 }
  0x7a   : > { %627 = vrcp.f32 %v304_v33  ;;  %v354_v48 = vadd.f32 1.0, %v353_v38  ;;  %vm994_vm9 = vcmp.lt.f32.partialorder %v347_v47, 0.0004427343 }
  0x7b   : > { %629 = vlog2.f32 %v303_v32  ;;  %v346_v62 = vmul.f32 %v622_v30, %v345_v44  ;;  %vm998_vm10 = vcmp.lt.f32.partialorder %v356_v52, 0.0004427343 }
  0x7c   : > { %631 = vlog2.f32 %v304_v33  ;;  %v355_v4 = vmul.f32 %v624_v31, %v354_v48  ;;  %v371_v31 = vrot.slane %v539_v23, %v965_v2 }
  0x83   : > { %v626_v53 = vpop.eup %625 }
  0x84   : > { %v628_v58 = vpop.eup %627  ;;  %v311_v59 = vmul.f32 %v626_v53, %v309_v45  ;;  %v315_v60 = vmul.f32 %v626_v53, %v313_v46 }
  0x85   : > { %v630_v63 = vpop.eup %629  ;;  %v312_v0 = vmul.f32 %v628_v58, %v310_v49  ;;  %v316_v1 = vmul.f32 %v628_v58, %v314_v50 }
  0x86   : > { %v632_v5 = vpop.eup %631  ;;  %v317_v6 = vmul.f32 %v540_v35, %v315_v60  ;;  %v321_v7 = vmul.f32 %v319_v39, %v311_v59  ;;  %v343_v8 = vmul.f32 0.6931472, %v630_v63 }
  0x87   : > { %v318_v12 = vmul.f32 %v541_v36, %v316_v1  ;;  %v322_v13 = vmul.f32 %v320_v40, %v312_v0  ;;  %v352_v15 = vmul.f32 0.6931472, %v632_v5 }
  0x88   : > { %v323_v16 = vadd.f32 %v321_v7, %v317_v6  ;;  %v349_v18 = vsel %vm994_vm9, %v346_v62, %v343_v8 }
  0x89   : > { %v324_v20 = vadd.f32 %v322_v13, %v318_v12  ;;  %v358_v22 = vsel %vm998_vm10, %v355_v4, %v352_v15  ;;  %v359_v25 = vadd.f32 %v349_v18, %v339_v61 }
  0x8a   : > { %v325_v24 = vmul.f32 %v323_v16, %v323_v16  ;;  %v360_v27 = vadd.f32 %v358_v22, %v340_v14 }
  0x8b   : > { %v326_v26 = vmul.f32 %v324_v20, %v324_v20 }
  0x8c   : > { %v333_v28 = vmul.f32 %v331_v17, %v325_v24 }
  0x8d   : > { %v334_v30 = vmul.f32 %v332_v21, %v326_v26 }
  0x8e   : > { %v362_v10 = vmul.f32 %v359_v25, %v333_v28 }
  0x8f   : > { %v363_v32 = vmul.f32 %v360_v27, %v334_v30 }
  0x90   : > { %v372_v33 = vmul.f32 %v367_v29, %v362_v10 }
  0x91   : > { %v373_v35 = vmul.f32 %v371_v31, %v363_v32 }
  0x93   : > { %v376_v36 = vcombine.low %v372_v33, %v373_v35  ;;  %v548_v9 = vcombine.low %v373_v35, %v373_v35 }
  0x95   : > { %v388_v34 = vsel %vm387_vm11, %v376_v36, 0.0  ;;  %v389_v37 = vsel %vm387_vm11, %v548_v9, 0.0 }
  0x96   : > { %v390_v38 = vadd.f32 %v389_v37, %v388_v34 }
  0x98   : > { %391 = vadd.xlane.f32.xlu0 %v390_v38 }
 0x125   : > { %v392_v39 = vpop.xlane.xlu0 %391 }
 0x126   : > { %v393_v40 = vrot.slane %v392_v39, 4 }
 0x128   : > { %v394_v41 = vadd.f32 %v393_v40, %v392_v39 }
 0x12a   : > { %v395_v42 = vrot.slane %v394_v41, 2 }
 0x12c   : > { %v396_v43 = vadd.f32 %v395_v42, %v394_v41 }
 0x12e   : > { %v397_v2 = vrot.slane %v396_v43, 1 }
 0x130   : > { %v398_v44 = vadd.f32 %v397_v2, %v396_v43 }
 0x132   : > { %549 = vpush %v398_v44 }
 0x163   : > { %s550_s20 = spop %549 }
 0x164   : > { %s400_s26 = smul.f32 0.00048828125, %s550_s20 }
 0x166   : > { %v401_v45 = vstv %s400_s26 }
 0x167   : > { %402 = vst [vmem:[%s217_s21] sm:$0xff] %v401_v45 }
 0x168   : > { %706 = shalt.err (!%p703_p2)
}
 0x169   : > { %s707_s15 = scalar_lea.hbm %s1018_s25, 128  ;;  %s711_s5 = scalar_lea.hbm %s1069_s2, 256 }
 0x16a   : > { %p708_p9 = scmp.ne.s32.totalorder %s1018_s25, %s707_s15  ;;  %p712_p6 = scmp.lt.u32.totalorder %s1018_s25, %s1069_s2 }
 0x16b   : > { %p713_p13 = scmp.lt.u32.totalorder %s711_s5, %s707_s15  ;;  %p715_p0 = scmp.lt.u32.totalorder %s707_s15, %s1018_s25 }
 0x16c   : > { %p709_p11 = pnand %p708_p9, %p1088_p5 }
 0x16d   : > { %p714_p8 = por %p713_p13, %p712_p6 }
 0x16e   : > { %p710_p3 = pneg %p709_p11 }
 0x16f   : > { %p716_p7 = por %p715_p0, %p714_p8 }
 0x171   : > { %p717_p4 = pnand %p716_p7, %p710_p3 }
 0x173   : > { %720 = shalt.err (!%p717_p4)
}
 0x174   : > { %555 = dma.vmem_to_hbm [thread:$0]  (%p1088_p5), %s1020_s19, 128, %s1018_s25, %s404_s3  }
 0x175 PF: > { %s429_s21 = sand.u32 1, %s759_s9   ;;  %p1089_p10 = scmp.ne.s32.totalorder %s1075_s24, 0 }
 0x176   : > { %p1090_p12 = scmp.ge.s32.totalorder %s779_s14, 2  ;;  %s430_s30 = scalar_lea.sflag [#allocation5], %s429_s21 }
 0x178   : > { %p565_p1 = pnand %p1090_p12, %p1089_p10 }
 0x17a   : > { %754 = dma.done.wait (!%p565_p1), %s430_s30, 128  }
 0x17b   : > { %756 = vsyncadd (!%p565_p1), %s430_s30, 4294967168  ;;  %s21_s14 = sadd.s32 1, %s779_s14   ;;  %s1091_s9 = smov %s763_s10 }
 0x17c   : > { %p18_p2 = scmp.ge.s32.totalorder %s21_s14, 4   ;;  %s1092_s10 = smov %s767_s11 }
 0x17d   : > { %s1093_s11 = smov %s857_s23  ;;  %s1094_s12 = smov %s775_s13 }
 0x17e   : > { %s1095_s13 = smov %s1097_s17  ;;  %20 = sbr.rel (!%p18_p2) target bundleno = 8 (0x8), region = 94 }
 0x185   :  { %435 = vsyncpa [#allocation4], 1 }
 0x186   :  { %437 = vsyncpa [#allocation4 + $0x1], 1 }
 0x187   :  { %438 = vsyncpa [#allocation7], 1 }
 0x188   :  { %440 = vsyncpa [#allocation7 + $0x1], 1 }
 0x189   :  { %441 = vsyncpa [#allocation5], 1 }
 0x18a   :  { %443 = vsyncpa [#allocation5 + $0x1], 1 }

</bundles_post_ra>
